<compile_context>
chip_gen: v5e
topology: v5e:2x2
jax: 0.10.0
libtpu: 0.0.40
codegen_flags: <defaults>
</compile_context>

<pallas_src>
import jax
import jax.numpy as jnp
from jax.experimental import pallas as pl
from jax.experimental.pallas import tpu as pltpu

_LANE = 128
_SUBLANE = 8
_MAX_BATCH_TILE = 512
_NEG_BIAS = -1e30  # padded fake-logit bias -> exp underflows to exactly 0


def _round_up(x, m):
    return ((x + m - 1) // m) * m


def _actor_kernel(x_ref, w1_ref, b1_ref, w2_ref, b2_ref, w3_ref, b3_ref, out_ref):
    # fc1: bf16 operands on the MXU, f32 accumulation; bias/relu in f32 (v5e-safe).
    x = x_ref[...].astype(jnp.bfloat16)
    h1 = jnp.dot(x, w1_ref[...], preferred_element_type=jnp.float32) + b1_ref[...]
    h1 = jnp.maximum(h1, 0.0).astype(jnp.bfloat16)

    # fc2
    h2 = jnp.dot(h1, w2_ref[...], preferred_element_type=jnp.float32) + b2_ref[...]
    h2 = jnp.maximum(h2, 0.0).astype(jnp.bfloat16)

    # fc3 (lane-padded to 128 output columns; padded columns carry -1e30 bias)
    logits = jnp.dot(h2, w3_ref[...], preferred_element_type=jnp.float32) + b3_ref[...]

    # softmax over the padded action dim (dim=1); padded columns contribute exactly 0.
    m = jnp.max(logits, axis=-1, keepdims=True)
    e = jnp.exp(logits - m)
    s = jnp.sum(e, axis=-1, keepdims=True)
    out_ref[...] = e * pl.reciprocal(s, approx=False)


@jax.jit
def discrete_actor_forward(state, w1, b1, w2, b2, w3, b3):
    B, K = state.shape
    H1 = w1.shape[1]
    H2 = w2.shape[1]
    N = w3.shape[1]

    # lane-align every feature dimension
    Kp = _round_up(max(K, _LANE), _LANE)
    H1p = _round_up(H1, _LANE)
    H2p = _round_up(H2, _LANE)
    Np = _round_up(max(N, _LANE), _LANE)

    # batch tiling: sublane-align, cap the tile, pad batch to a tile multiple
    B8 = _round_up(max(B, _SUBLANE), _SUBLANE)
    TB = min(_MAX_BATCH_TILE, B8)
    Bp = _round_up(B8, TB)

    # pad inputs / params; weights go to bf16, biases stay f32
    x_p = jnp.pad(state.astype(jnp.float32), ((0, Bp - B), (0, Kp - K)))
    w1_p = jnp.pad(w1, ((0, Kp - K), (0, H1p - H1))).astype(jnp.bfloat16)
    b1_p = jnp.pad(b1.reshape(1, -1).astype(jnp.float32), ((0, 0), (0, H1p - H1)))
    w2_p = jnp.pad(w2, ((0, H1p - H1), (0, H2p - H2))).astype(jnp.bfloat16)
    b2_p = jnp.pad(b2.reshape(1, -1).astype(jnp.float32), ((0, 0), (0, H2p - H2)))
    w3_p = jnp.pad(w3, ((0, H2p - H2), (0, Np - N))).astype(jnp.bfloat16)
    b3_p = jnp.pad(b3.reshape(1, -1).astype(jnp.float32), ((0, 0), (0, Np - N)),
                   constant_values=_NEG_BIAS)

    resident = lambda i: (0, 0)  # weights/biases stay loaded across grid steps

    out = pl.pallas_call(
        _actor_kernel,
        out_shape=jax.ShapeDtypeStruct((Bp, Np), jnp.float32),
        grid_spec=pltpu.PrefetchScalarGridSpec(
            num_scalar_prefetch=0,
            grid=(Bp // TB,),
            in_specs=[
                pl.BlockSpec((TB, Kp), lambda i: (i, 0)),   # x tile
                pl.BlockSpec((Kp, H1p), resident),          # w1
                pl.BlockSpec((1, H1p), resident),           # b1
                pl.BlockSpec((H1p, H2p), resident),         # w2
                pl.BlockSpec((1, H2p), resident),           # b2
                pl.BlockSpec((H2p, Np), resident),          # w3 (lane-padded)
                pl.BlockSpec((1, Np), resident),            # b3 (lane-padded, -1e30 fill)
            ],
            out_specs=pl.BlockSpec((TB, Np), lambda i: (i, 0)),
        ),
        compiler_params=pltpu.CompilerParams(
            dimension_semantics=("parallel",),  # batch tiles -> both TCs on v7x
        ),
    )(x_p, w1_p, b1_p, w2_p, b2_p, w3_p, b3_p)

    return out[:B, :N]


def init_params(key, input_size, fc1_size, fc2_size, n_actions):
    """Deterministic synthetic params. PyTorch Linear is y = x @ W.T + b with
    W shape (out, in); we store the transpose (in, out) for the kernel."""
    ks = jax.random.split(key, 6)

    def uniform_linear(kw, kb, fan_in, fan_out):
        # mimic nn.Linear default init: U(-1/sqrt(fan_in), 1/sqrt(fan_in))
        bound = 1.0 / jnp.sqrt(jnp.float32(fan_in))
        w = jax.random.uniform(kw, (fan_in, fan_out), jnp.float32, -bound, bound)
        b = jax.random.uniform(kb, (1, fan_out), jnp.float32, -bound, bound)
        return w, b

    w1, b1 = uniform_linear(ks[0], ks[1], input_size, fc1_size)
    w2, b2 = uniform_linear(ks[2], ks[3], fc1_size, fc2_size)
    w3, b3 = uniform_linear(ks[4], ks[5], fc2_size, n_actions)
    return w1, b1, w2, b2, w3, b3


if __name__ == "__main__":
    key = jax.random.PRNGKey(0)
    kx, kp = jax.random.split(key)

    batch = 8
    input_size = 32
    fc1_size = 256
    fc2_size = 256
    n_actions = 2

    state = jax.random.normal(kx, (batch, input_size), dtype=jnp.float32)
    params = init_params(kp, input_size, fc1_size, fc2_size, n_actions)

    mu = discrete_actor_forward(state, *params)
    mu = jax.block_until_ready(mu)

    # pure-JAX reference using the same bf16 weights / bf16 matmul operands with f32 accumulation
    w1, b1, w2, b2, w3, b3 = params

    def bf16_dot(a, b):
        return jnp.dot(a.astype(jnp.bfloat16), b.astype(jnp.bfloat16),
                       preferred_element_type=jnp.float32)

    h = jnp.maximum(bf16_dot(state, w1) + b1, 0.0)
    h = jnp.maximum(bf16_dot(h, w2) + b2, 0.0)
    ref = jax.nn.softmax(bf16_dot(h, w3) + b3, axis=1)

    assert mu.shape == (batch, n_actions)
    assert jnp.allclose(mu, ref, atol=1e-5, rtol=1e-4), float(jnp.max(jnp.abs(mu - ref)))
    assert jnp.allclose(jnp.sum(mu, axis=1), 1.0, atol=1e-5)

    print("KERNEL_OK")
</pallas_src>

<mosaic_0001>
module attributes {stable_mosaic.version = 11 : i64} {
  func.func @_actor_kernel(%arg0: i32, %arg1: memref<8x128xf32, #tpu.memory_space<vmem>>, %arg2: memref<128x256xbf16, #tpu.memory_space<vmem>>, %arg3: memref<1x256xf32, #tpu.memory_space<vmem>>, %arg4: memref<256x256xbf16, #tpu.memory_space<vmem>>, %arg5: memref<1x256xf32, #tpu.memory_space<vmem>>, %arg6: memref<256x128xbf16, #tpu.memory_space<vmem>>, %arg7: memref<1x128xf32, #tpu.memory_space<vmem>>, %arg8: memref<8x128xf32, #tpu.memory_space<vmem>>) attributes {dimension_semantics = [#tpu.dimension_semantics<parallel>], iteration_bounds = array<i64: 1>, scalar_prefetch = 0 : i64, scratch_operands = 0 : i64, tpu.core_type = #tpu.core_type<tc>, window_params = [{transform_indices = @transform_0, window_bounds = array<i64: 8, 128>}, {pipeline_mode = #tpu.pipeline_mode<synchronous>, transform_indices = @transform_1, window_bounds = array<i64: 128, 256>}, {pipeline_mode = #tpu.pipeline_mode<synchronous>, transform_indices = @transform_2, window_bounds = array<i64: 1, 256>}, {pipeline_mode = #tpu.pipeline_mode<synchronous>, transform_indices = @transform_3, window_bounds = array<i64: 256, 256>}, {pipeline_mode = #tpu.pipeline_mode<synchronous>, transform_indices = @transform_4, window_bounds = array<i64: 1, 256>}, {pipeline_mode = #tpu.pipeline_mode<synchronous>, transform_indices = @transform_5, window_bounds = array<i64: 256, 128>}, {pipeline_mode = #tpu.pipeline_mode<synchronous>, transform_indices = @transform_6, window_bounds = array<i64: 1, 128>}, {transform_indices = @transform_7, window_bounds = array<i64: 8, 128>}]} {
    %c0 = arith.constant 0 : index
    %c0_0 = arith.constant 0 : index
    %0 = vector.load %arg1[%c0, %c0_0] : memref<8x128xf32, #tpu.memory_space<vmem>>, vector<8x128xf32>
    %1 = arith.truncf %0 : vector<8x128xf32> to vector<8x128xbf16>
    %c0_1 = arith.constant 0 : index
    %c0_2 = arith.constant 0 : index
    %2 = vector.load %arg2[%c0_1, %c0_2] : memref<128x256xbf16, #tpu.memory_space<vmem>>, vector<128x256xbf16>
    %cst = arith.constant dense<0.000000e+00> : vector<8x256xf32>
    %3 = tpu.matmul %1, %2, %cst {dimension_numbers = #tpu.dot_dimension_numbers<[1], [0], [0], [1], [0, 0, 1, 1], [], []>} : vector<8x128xbf16>, vector<128x256xbf16>, vector<8x256xf32> -> vector<8x256xf32>
    %c0_3 = arith.constant 0 : index
    %c0_4 = arith.constant 0 : index
    %4 = vector.load %arg3[%c0_3, %c0_4] : memref<1x256xf32, #tpu.memory_space<vmem>>, vector<1x256xf32>
    %5 = vector.broadcast %4 : vector<1x256xf32> to vector<8x256xf32>
    %6 = arith.addf %3, %5 : vector<8x256xf32>
    %cst_5 = arith.constant 0.000000e+00 : f32
    %7 = vector.broadcast %cst_5 : f32 to vector<8x256xf32>
    %8 = arith.maximumf %6, %7 : vector<8x256xf32>
    %9 = arith.truncf %8 : vector<8x256xf32> to vector<8x256xbf16>
    %c0_6 = arith.constant 0 : index
    %c0_7 = arith.constant 0 : index
    %10 = vector.load %arg4[%c0_6, %c0_7] : memref<256x256xbf16, #tpu.memory_space<vmem>>, vector<256x256xbf16>
    %cst_8 = arith.constant dense<0.000000e+00> : vector<8x256xf32>
    %11 = tpu.matmul %9, %10, %cst_8 {dimension_numbers = #tpu.dot_dimension_numbers<[1], [0], [0], [1], [0, 0, 1, 1], [], []>} : vector<8x256xbf16>, vector<256x256xbf16>, vector<8x256xf32> -> vector<8x256xf32>
    %c0_9 = arith.constant 0 : index
    %c0_10 = arith.constant 0 : index
    %12 = vector.load %arg5[%c0_9, %c0_10] : memref<1x256xf32, #tpu.memory_space<vmem>>, vector<1x256xf32>
    %13 = vector.broadcast %12 : vector<1x256xf32> to vector<8x256xf32>
    %14 = arith.addf %11, %13 : vector<8x256xf32>
    %cst_11 = arith.constant 0.000000e+00 : f32
    %15 = vector.broadcast %cst_11 : f32 to vector<8x256xf32>
    %16 = arith.maximumf %14, %15 : vector<8x256xf32>
    %17 = arith.truncf %16 : vector<8x256xf32> to vector<8x256xbf16>
    %c0_12 = arith.constant 0 : index
    %c0_13 = arith.constant 0 : index
    %18 = vector.load %arg6[%c0_12, %c0_13] : memref<256x128xbf16, #tpu.memory_space<vmem>>, vector<256x128xbf16>
    %cst_14 = arith.constant dense<0.000000e+00> : vector<8x128xf32>
    %19 = tpu.matmul %17, %18, %cst_14 {dimension_numbers = #tpu.dot_dimension_numbers<[1], [0], [0], [1], [0, 0, 1, 1], [], []>} : vector<8x256xbf16>, vector<256x128xbf16>, vector<8x128xf32> -> vector<8x128xf32>
    %c0_15 = arith.constant 0 : index
    %c0_16 = arith.constant 0 : index
    %20 = vector.load %arg7[%c0_15, %c0_16] : memref<1x128xf32, #tpu.memory_space<vmem>>, vector<1x128xf32>
    %21 = vector.broadcast %20 : vector<1x128xf32> to vector<8x128xf32>
    %22 = arith.addf %19, %21 : vector<8x128xf32>
    %cst_17 = arith.constant dense<0xFF800000> : vector<8xf32>
    %23 = vector.multi_reduction <maximumf>, %22, %cst_17 [1] : vector<8x128xf32> to vector<8xf32>
    %24 = vector.shape_cast %23 : vector<8xf32> to vector<8x1xf32>
    %25 = vector.broadcast %24 : vector<8x1xf32> to vector<8x128xf32>
    %26 = arith.subf %22, %25 : vector<8x128xf32>
    %27 = math.exp %26 : vector<8x128xf32>
    %cst_18 = arith.constant dense<0.000000e+00> : vector<8xf32>
    %28 = vector.multi_reduction <add>, %27, %cst_18 [1] : vector<8x128xf32> to vector<8xf32>
    %29 = vector.shape_cast %28 : vector<8xf32> to vector<8x1xf32>
    %30 = tpu.reciprocal %29 : vector<8x1xf32> -> vector<8x1xf32>
    %31 = vector.broadcast %30 : vector<8x1xf32> to vector<8x128xf32>
    %32 = arith.mulf %27, %31 : vector<8x128xf32>
    %c0_19 = arith.constant 0 : index
    %c0_20 = arith.constant 0 : index
    %33 = vector.load %arg8[%c0_19, %c0_20] : memref<8x128xf32, #tpu.memory_space<vmem>>, vector<8x128xf32>
    tpu.vector_store %arg8[%c0_19, %c0_20], %32 {strides = array<i32>} : memref<8x128xf32, #tpu.memory_space<vmem>>, vector<8x128xf32>,
    return
  }
  func.func @transform_0(%arg0: i32) -> (i32, i32) {
    %c0_i32 = arith.constant 0 : i32
    %c0_i32_0 = arith.constant 0 : i32
    return %arg0, %c0_i32 : i32, i32
  }
  func.func @transform_1(%arg0: i32) -> (i32, i32) {
    %c0_i32 = arith.constant 0 : i32
    %c0_i32_0 = arith.constant 0 : i32
    %c0_i32_1 = arith.constant 0 : i32
    return %c0_i32, %c0_i32_0 : i32, i32
  }
  func.func @transform_2(%arg0: i32) -> (i32, i32) {
    %c0_i32 = arith.constant 0 : i32
    %c0_i32_0 = arith.constant 0 : i32
    %c0_i32_1 = arith.constant 0 : i32
    return %c0_i32, %c0_i32_0 : i32, i32
  }
  func.func @transform_3(%arg0: i32) -> (i32, i32) {
    %c0_i32 = arith.constant 0 : i32
    %c0_i32_0 = arith.constant 0 : i32
    %c0_i32_1 = arith.constant 0 : i32
    return %c0_i32, %c0_i32_0 : i32, i32
  }
  func.func @transform_4(%arg0: i32) -> (i32, i32) {
    %c0_i32 = arith.constant 0 : i32
    %c0_i32_0 = arith.constant 0 : i32
    %c0_i32_1 = arith.constant 0 : i32
    return %c0_i32, %c0_i32_0 : i32, i32
  }
  func.func @transform_5(%arg0: i32) -> (i32, i32) {
    %c0_i32 = arith.constant 0 : i32
    %c0_i32_0 = arith.constant 0 : i32
    %c0_i32_1 = arith.constant 0 : i32
    return %c0_i32, %c0_i32_0 : i32, i32
  }
  func.func @transform_6(%arg0: i32) -> (i32, i32) {
    %c0_i32 = arith.constant 0 : i32
    %c0_i32_0 = arith.constant 0 : i32
    %c0_i32_1 = arith.constant 0 : i32
    return %c0_i32, %c0_i32_0 : i32, i32
  }
  func.func @transform_7(%arg0: i32) -> (i32, i32) {
    %c0_i32 = arith.constant 0 : i32
    %c0_i32_0 = arith.constant 0 : i32
    return %arg0, %c0_i32 : i32, i32
  }
}

</mosaic_0001>

<bundles_post_ra>
// kernel: discrete_actor_forward.1
= control target key start
LH: loop header
LB: loop body
LE: loop exit
PB: predicated region body
PF: predicated region fallthrough
CT: control target
= control target key end

     0   :  { %s1315_s1 = inlined_call_operand.vmem [shape: bf16[128,256], index: 1, kind: input, shape index: {}]   ;;  %s1316_s3 = inlined_call_operand.vmem [shape: bf16[256,256], index: 3, kind: input, shape index: {}]   ;;  %s1317_s0 = inlined_call_operand.vmem [shape: f32[8,128], index: 0, kind: input, shape index: {}]   ;;  %s1318_s5 = inlined_call_operand.vmem [shape: bf16[256,128], index: 5, kind: input, shape index: {}]   ;;  %s1319_s2 = inlined_call_operand.vmem [shape: f32[1,256], index: 2, kind: input, shape index: {}]   ;;  %s1320_s4 = inlined_call_operand.vmem [shape: f32[1,256], index: 4, kind: input, shape index: {}]   ;;  %s1321_s6 = inlined_call_operand.vmem [shape: f32[1,128], index: 6, kind: input, shape index: {}]   ;;  %s1322_s7 = inlined_call_operand.vmem [shape: f32[8,128], index: 7, kind: output, shape index: {}]  }
   0x1   :  { %v657_v0 = vld [vmem:[%s1315_s1 + $0x70] sm:$0xf]  ;;  %v870_v1 = vld [vmem:[%s1315_s1 + $0x74] sm:$0xf0]  ;;  %v869_v2 = vld [vmem:[%s1315_s1 + $0x74] sm:$0xf] }
   0x2   :  { %v658_v3 = vor.u32 %v870_v1, %v657_v0  ;;  %v659_v4 = vld [vmem:[%s1315_s1 + $0x78] sm:$0xf0]  ;;  %v649_v5 = vld [vmem:[%s1315_s1 + $0x60] sm:$0xf]  ;;  %v868_v6 = vld [vmem:[%s1315_s1 + $0x64] sm:$0xf0] }
   0x3   :  { %v662_v7 = vor.u32 %v869_v2, %v659_v4  ;;  %v867_v8 = vld [vmem:[%s1315_s1 + $0x64] sm:$0xf]  ;;  %v651_v9 = vld [vmem:[%s1315_s1 + $0x68] sm:$0xf0]  ;;  %v650_v10 = vor.u32 %v868_v6, %v649_v5  ;;  %v641_v12 = vld [vmem:[%s1315_s1 + $0x50] sm:$0xf] }
   0x4   :  { %130 = vmatpush.bf16.msra.mxu0 %v658_v3  ;;  %v654_v11 = vor.u32 %v867_v8, %v651_v9  ;;  %v866_v13 = vld [vmem:[%s1315_s1 + $0x54] sm:$0xf0]  ;;  %v865_v14 = vld [vmem:[%s1315_s1 + $0x54] sm:$0xf]  ;;  %v643_v15 = vld [vmem:[%s1315_s1 + $0x58] sm:$0xf0] }
   0x5   :  { %143 = vmatpush.bf16.msra.mxu1 %v662_v7  ;;  %v642_v16 = vor.u32 %v866_v13, %v641_v12  ;;  %v646_v17 = vor.u32 %v865_v14, %v643_v15  ;;  %v633_v18 = vld [vmem:[%s1315_s1 + $0x40] sm:$0xf]  ;;  %v864_v19 = vld [vmem:[%s1315_s1 + $0x44] sm:$0xf0]  ;;  %v863_v20 = vld [vmem:[%s1315_s1 + $0x44] sm:$0xf] }
   0x6   :  { %v635_v21 = vld [vmem:[%s1315_s1 + $0x48] sm:$0xf0]  ;;  %v634_v22 = vor.u32 %v864_v19, %v633_v18  ;;  %v721_v23 = vld [vmem:[%s1316_s3 + $0x70] sm:$0xf]  ;;  %v886_v24 = vld [vmem:[%s1316_s3 + $0x74] sm:$0xf0] }
   0x7   :  { %v785_v25 = vld [vmem:[%s1316_s3 + $0xf0] sm:$0xf]  ;;  %v638_v26 = vor.u32 %v863_v20, %v635_v21  ;;  %v862_v28 = vld [vmem:[%s1315_s1 + $0x34] sm:$0xf0]  ;;  %v722_v29 = vor.u32 %v886_v24, %v721_v23  ;;  %v861_v31 = vld [vmem:[%s1315_s1 + $0x34] sm:$0xf] }
   0x8   :  { %131 = vmatpush.bf16.msra.mxu0 %v650_v10  ;;  %v625_v27 = vld [vmem:[%s1315_s1 + $0x30] sm:$0xf]  ;;  %v902_v30 = vld [vmem:[%s1316_s3 + $0xf4] sm:$0xf0]  ;;  %v627_v32 = vld [vmem:[%s1315_s1 + $0x38] sm:$0xf0] }
   0x9   :  { %144 = vmatpush.bf16.msra.mxu1 %v654_v11  ;;  %v786_v33 = vor.u32 %v902_v30, %v785_v25  ;;  %v713_v34 = vld [vmem:[%s1316_s3 + $0x60] sm:$0xf]  ;;  %358 = vmatpush.bf16.msra.mxu2 %v722_v29  ;;  %v884_v35 = vld [vmem:[%s1316_s3 + $0x64] sm:$0xf0]  ;;  %v626_v38 = vor.u32 %v862_v28, %v625_v27  ;;  %v630_v43 = vor.u32 %v861_v31, %v627_v32  ;;  %v859_v44 = vld [vmem:[%s1315_s1 + $0x24] sm:$0xf] }
   0xa   :  { %v777_v36 = vld [vmem:[%s1316_s3 + $0xe0] sm:$0xf]  ;;  %v900_v37 = vld [vmem:[%s1316_s3 + $0xe4] sm:$0xf0]  ;;  %v714_v41 = vor.u32 %v884_v35, %v713_v34  ;;  %v705_v45 = vld [vmem:[%s1316_s3 + $0x50] sm:$0xf] }
   0xb   :  { %v617_v39 = vld [vmem:[%s1315_s1 + $0x20] sm:$0xf]  ;;  %v860_v40 = vld [vmem:[%s1315_s1 + $0x24] sm:$0xf0]  ;;  %371 = vmatpush.bf16.msra.mxu3 %v786_v33  ;;  %v778_v42 = vor.u32 %v900_v37, %v777_v36  ;;  %v882_v46 = vld [vmem:[%s1316_s3 + $0x54] sm:$0xf0] }
   0xc   :  { %132 = vmatpush.bf16.msra.mxu0 %v642_v16  ;;  %v619_v47 = vld [vmem:[%s1315_s1 + $0x28] sm:$0xf0]  ;;  %v769_v48 = vld [vmem:[%s1316_s3 + $0xd0] sm:$0xf]  ;;  %v898_v49 = vld [vmem:[%s1316_s3 + $0xd4] sm:$0xf0]  ;;  %v706_v50 = vor.u32 %v882_v46, %v705_v45  ;;  %v618_v51 = vor.u32 %v860_v40, %v617_v39 }
   0xd   :  { %145 = vmatpush.bf16.msra.mxu1 %v646_v17  ;;  %359 = vmatpush.bf16.msra.mxu2 %v714_v41  ;;  %v609_v52 = vld [vmem:[%s1315_s1 + $0x10] sm:$0xf]  ;;  %v770_v53 = vor.u32 %v898_v49, %v769_v48  ;;  %v697_v54 = vld [vmem:[%s1316_s3 + $0x40] sm:$0xf]  ;;  %v880_v55 = vld [vmem:[%s1316_s3 + $0x44] sm:$0xf0]  ;;  %v622_v56 = vor.u32 %v859_v44, %v619_v47 }
   0xe   :  { %v858_v57 = vld [vmem:[%s1315_s1 + $0x14] sm:$0xf0]  ;;  %v761_v58 = vld [vmem:[%s1316_s3 + $0xc0] sm:$0xf]  ;;  %v896_v59 = vld [vmem:[%s1316_s3 + $0xc4] sm:$0xf0]  ;;  %v698_v63 = vor.u32 %v880_v55, %v697_v54 }
   0xf   :  { %372 = vmatpush.bf16.msra.mxu3 %v778_v42  ;;  %v857_v60 = vld [vmem:[%s1315_s1 + $0x14] sm:$0xf]  ;;  %v611_v61 = vld [vmem:[%s1315_s1 + $0x18] sm:$0xf0]  ;;  %v601_v62 = vld [vmem:[%s1315_s1] sm:$0xf]  ;;  %v610_v0 = vor.u32 %v858_v57, %v609_v52  ;;  %v762_v2 = vor.u32 %v896_v59, %v761_v58 }
  0x10   :  { %133 = vmatpush.bf16.msra.mxu0 %v634_v22  ;;  %v856_v1 = vld [vmem:[%s1315_s1 + $0x4] sm:$0xf0]  ;;  %v689_v3 = vld [vmem:[%s1316_s3 + $0x30] sm:$0xf]  ;;  %v878_v4 = vld [vmem:[%s1316_s3 + $0x34] sm:$0xf0]  ;;  %v614_v5 = vor.u32 %v857_v60, %v611_v61 }
  0x11   :  { %146 = vmatpush.bf16.msra.mxu1 %v638_v26  ;;  %360 = vmatpush.bf16.msra.mxu2 %v706_v50  ;;  %v855_v6 = vld [vmem:[%s1315_s1 + $0x4] sm:$0xf]  ;;  %v753_v7 = vld [vmem:[%s1316_s3 + $0xb0] sm:$0xf]  ;;  %v894_v8 = vld [vmem:[%s1316_s3 + $0xb4] sm:$0xf0]  ;;  %v690_v14 = vor.u32 %v878_v4, %v689_v3  ;;  %v602_v15 = vor.u32 %v856_v1, %v601_v62 }
  0x12   :  { %v603_v9 = vld [vmem:[%s1315_s1 + $0x8] sm:$0xf0]  ;;  %v885_v10 = vld [vmem:[%s1316_s3 + $0x74] sm:$0xf]  ;;  %v723_v11 = vld [vmem:[%s1316_s3 + $0x78] sm:$0xf0]  ;;  %v754_v17 = vor.u32 %v894_v8, %v753_v7 }
  0x13   :  { %373 = vmatpush.bf16.msra.mxu3 %v770_v53  ;;  %v901_v12 = vld [vmem:[%s1316_s3 + $0xf4] sm:$0xf]  ;;  %v787_v13 = vld [vmem:[%s1316_s3 + $0xf8] sm:$0xf0]  ;;  %v26_v16 = vld [vmem:[%s1317_s0] sm:$0xff]  ;;  %v606_v20 = vor.u32 %v855_v6, %v603_v9  ;;  %v726_v21 = vor.u32 %v885_v10, %v723_v11 }
  0x14   :  { %134 = vmatpush.bf16.msra.mxu0 %v626_v38  ;;  %v681_v18 = vld [vmem:[%s1316_s3 + $0x20] sm:$0xf]  ;;  %v876_v19 = vld [vmem:[%s1316_s3 + $0x24] sm:$0xf0]  ;;  %v790_v24 = vor.u32 %v901_v12, %v787_v13  ;;  %v883_v25 = vld [vmem:[%s1316_s3 + $0x64] sm:$0xf]  ;;  %v27_v27 = vpack.c.bf16 %v26_v16, %v26_v16 }
  0x15   :  { %147 = vmatpush.bf16.msra.mxu1 %v630_v43  ;;  %361 = vmatpush.bf16.msra.mxu2 %v698_v63  ;;  %v745_v22 = vld [vmem:[%s1316_s3 + $0xa0] sm:$0xf]  ;;  %v892_v23 = vld [vmem:[%s1316_s3 + $0xa4] sm:$0xf0]  ;;  %v715_v26 = vld [vmem:[%s1316_s3 + $0x68] sm:$0xf0]  ;;  %v682_v30 = vor.u32 %v876_v19, %v681_v18 }
  0x16   :  { %v899_v28 = vld [vmem:[%s1316_s3 + $0xe4] sm:$0xf]  ;;  %v779_v29 = vld [vmem:[%s1316_s3 + $0xe8] sm:$0xf0]  ;;  %v746_v31 = vor.u32 %v892_v23, %v745_v22  ;;  %v718_v32 = vor.u32 %v883_v25, %v715_v26  ;;  %v881_v34 = vld [vmem:[%s1316_s3 + $0x54] sm:$0xf] }
  0x17   :  { %374 = vmatpush.bf16.msra.mxu3 %v762_v2  ;;  %v782_v33 = vor.u32 %v899_v28, %v779_v29  ;;  %v707_v35 = vld [vmem:[%s1316_s3 + $0x58] sm:$0xf0]  ;;  %v897_v36 = vld [vmem:[%s1316_s3 + $0xd4] sm:$0xf]  ;;  %v879_v40 = vld [vmem:[%s1316_s3 + $0x44] sm:$0xf] }
  0x18   :  { %135 = vmatpush.bf16.msra.mxu0 %v618_v51  ;;  %v771_v37 = vld [vmem:[%s1316_s3 + $0xd8] sm:$0xf0]  ;;  %v710_v38 = vor.u32 %v881_v34, %v707_v35  ;;  %v699_v41 = vld [vmem:[%s1316_s3 + $0x48] sm:$0xf0]  ;;  %v895_v42 = vld [vmem:[%s1316_s3 + $0xc4] sm:$0xf] }
  0x19   :  { %148 = vmatpush.bf16.msra.mxu1 %v622_v56  ;;  %362 = vmatpush.bf16.msra.mxu2 %v690_v14  ;;  %v774_v39 = vor.u32 %v897_v36, %v771_v37  ;;  %v763_v43 = vld [vmem:[%s1316_s3 + $0xc8] sm:$0xf0]  ;;  %v702_v44 = vor.u32 %v879_v40, %v699_v41  ;;  %v877_v46 = vld [vmem:[%s1316_s3 + $0x34] sm:$0xf]  ;;  %v691_v47 = vld [vmem:[%s1316_s3 + $0x38] sm:$0xf0] }
  0x1a   :  { %v766_v45 = vor.u32 %v895_v42, %v763_v43  ;;  %v893_v48 = vld [vmem:[%s1316_s3 + $0xb4] sm:$0xf]  ;;  %v755_v49 = vld [vmem:[%s1316_s3 + $0xb8] sm:$0xf0]  ;;  %v694_v50 = vor.u32 %v877_v46, %v691_v47  ;;  %v875_v52 = vld [vmem:[%s1316_s3 + $0x24] sm:$0xf] }
  0x1b   :  { %375 = vmatpush.bf16.msra.mxu3 %v754_v17  ;;  %v758_v51 = vor.u32 %v893_v48, %v755_v49  ;;  %v683_v53 = vld [vmem:[%s1316_s3 + $0x28] sm:$0xf0]  ;;  %v891_v54 = vld [vmem:[%s1316_s3 + $0xa4] sm:$0xf]  ;;  %v673_v58 = vld [vmem:[%s1316_s3 + $0x10] sm:$0xf] }
  0x1c   :  { %136 = vmatpush.bf16.msra.mxu0 %v610_v0  ;;  %v747_v55 = vld [vmem:[%s1316_s3 + $0xa8] sm:$0xf0]  ;;  %v686_v56 = vor.u32 %v875_v52, %v683_v53  ;;  %v874_v59 = vld [vmem:[%s1316_s3 + $0x14] sm:$0xf0]  ;;  %v737_v60 = vld [vmem:[%s1316_s3 + $0x90] sm:$0xf] }
  0x1d   :  { %149 = vmatpush.bf16.msra.mxu1 %v614_v5  ;;  %363 = vmatpush.bf16.msra.mxu2 %v682_v30  ;;  %v750_v57 = vor.u32 %v891_v54, %v747_v55  ;;  %v674_v61 = vor.u32 %v874_v59, %v673_v58  ;;  %v890_v62 = vld [vmem:[%s1316_s3 + $0x94] sm:$0xf0]  ;;  %v873_v63 = vld [vmem:[%s1316_s3 + $0x14] sm:$0xf]  ;;  %v675_v0 = vld [vmem:[%s1316_s3 + $0x18] sm:$0xf0] }
  0x1e   :  { %v738_v1 = vor.u32 %v890_v62, %v737_v60  ;;  %v678_v2 = vor.u32 %v873_v63, %v675_v0  ;;  %v889_v3 = vld [vmem:[%s1316_s3 + $0x94] sm:$0xf]  ;;  %v739_v4 = vld [vmem:[%s1316_s3 + $0x98] sm:$0xf0]  ;;  %v665_v6 = vld [vmem:[%s1316_s3] sm:$0xf] }
  0x1f   :  { %376 = vmatpush.bf16.msra.mxu3 %v746_v31  ;;  %v742_v5 = vor.u32 %v889_v3, %v739_v4  ;;  %v872_v7 = vld [vmem:[%s1316_s3 + $0x4] sm:$0xf0]  ;;  %v729_v8 = vld [vmem:[%s1316_s3 + $0x80] sm:$0xf]  ;;  %v871_v11 = vld [vmem:[%s1316_s3 + $0x4] sm:$0xf] }
  0x20   :  { %137 = vmatpush.bf16.msra.mxu0 %v602_v15  ;;  %v666_v9 = vor.u32 %v872_v7, %v665_v6  ;;  %v888_v10 = vld [vmem:[%s1316_s3 + $0x84] sm:$0xf0]  ;;  %v667_v12 = vld [vmem:[%s1316_s3 + $0x8] sm:$0xf0]  ;;  %v887_v15 = vld [vmem:[%s1316_s3 + $0x84] sm:$0xf] }
  0x21   :  { %150 = vmatpush.bf16.msra.mxu1 %v606_v20  ;;  %364 = vmatpush.bf16.msra.mxu2 %v674_v61  ;;  %v730_v13 = vor.u32 %v888_v10, %v729_v8  ;;  %v670_v14 = vor.u32 %v871_v11, %v667_v12  ;;  %v731_v16 = vld [vmem:[%s1316_s3 + $0x88] sm:$0xf0]  ;;  %v918_v18 = vld [vmem:[%s1318_s5 + $0x78] sm:$0xff]  ;;  %v917_v20 = vld [vmem:[%s1318_s5 + $0x70] sm:$0xff] }
  0x22   :  { %v734_v17 = vor.u32 %v887_v15, %v731_v16  ;;  %v910_v19 = vld [vmem:[%s1318_s5 + $0x38] sm:$0xff]  ;;  %v916_v22 = vld [vmem:[%s1318_s5 + $0x68] sm:$0xff]  ;;  %v907_v25 = vld [vmem:[%s1318_s5 + $0x20] sm:$0xff] }
  0x23   :  { %138 = vmatmul.bf16.vlgmr.msra.gmra.mxu0 %v27_v27  ;;  %377 = vmatpush.bf16.msra.mxu3 %v738_v1  ;;  %v908_v23 = vld [vmem:[%s1318_s5 + $0x28] sm:$0xff]  ;;  %v914_v26 = vld [vmem:[%s1318_s5 + $0x58] sm:$0xff]  ;;  %v913_v28 = vld [vmem:[%s1318_s5 + $0x50] sm:$0xff] }
  0x24   :  { %384 = vmatpush.bf16.msrb.mxu0 %v726_v21  ;;  %151 = vmatmul.bf16.vlgmr.msra.gmra.mxu1 %v27_v27  ;;  %v909_v21 = vld [vmem:[%s1318_s5 + $0x30] sm:$0xff]  ;;  %v44_v27 = vld [vmem:[%s1319_s2] sm:$0x3]  ;;  %v906_v41 = vld [vmem:[%s1318_s5 + $0x18] sm:$0xff] }
  0x25   :  { %397 = vmatpush.bf16.msrb.mxu1 %v790_v24  ;;  %365 = vmatpush.bf16.msra.mxu2 %v666_v9  ;;  %v915_v24 = vld [vmem:[%s1318_s5 + $0x60] sm:$0xff]  ;;  %v46_v29 = vperm.slane %v44_v27, 0  ;;  %v47_v30 = vperm.slane %v44_v27, 1  ;;  %v912_v42 = vld [vmem:[%s1318_s5 + $0x48] sm:$0xff]  ;;  %v905_v43 = vld [vmem:[%s1318_s5 + $0x10] sm:$0xff] }
  0x26   :  { %v903_v46 = vld [vmem:[%s1318_s5] sm:$0xff] }
  0x27   :  { %378 = vmatpush.bf16.msra.mxu3 %v730_v13  ;;  %v192_v47 = vld [vmem:[%s1320_s4] sm:$0x3] }
  0x28   :  { %385 = vmatpush.bf16.msrb.mxu0 %v718_v32  ;;  %v195_v48 = vperm.slane %v192_v47, 1  ;;  %v194_v53 = vperm.slane %v192_v47, 0  ;;  %v919_v3 = vld [vmem:[%s1321_s6] ss:$0 sm:$0xff] }
  0x29   :  { %398 = vmatpush.bf16.msrb.mxu1 %v782_v33  ;;  %546 = vmatpush.bf16.msrb.mxu2 %v910_v19 }
  0x2b   :  { %559 = vmatpush.bf16.msrb.mxu3 %v918_v18 }
  0x2c   :  { %386 = vmatpush.bf16.msrb.mxu0 %v710_v38 }
  0x2d   :  { %399 = vmatpush.bf16.msrb.mxu1 %v774_v39  ;;  %547 = vmatpush.bf16.msrb.mxu2 %v909_v21 }
  0x2f   :  { %560 = vmatpush.bf16.msrb.mxu3 %v917_v20 }
  0x30   :  { %387 = vmatpush.bf16.msrb.mxu0 %v702_v44  ;;  %v911_v44 = vld [vmem:[%s1318_s5 + $0x40] sm:$0xff] }
  0x31   :  { %400 = vmatpush.bf16.msrb.mxu1 %v766_v45  ;;  %548 = vmatpush.bf16.msrb.mxu2 %v908_v23  ;;  %v904_v45 = vld [vmem:[%s1318_s5 + $0x8] sm:$0xff] }
  0x33   :  { %561 = vmatpush.bf16.msrb.mxu3 %v916_v22 }
  0x34   :  { %388 = vmatpush.bf16.msrb.mxu0 %v694_v50 }
  0x35   :  { %401 = vmatpush.bf16.msrb.mxu1 %v758_v51  ;;  %549 = vmatpush.bf16.msrb.mxu2 %v907_v25 }
  0x37   :  { %562 = vmatpush.bf16.msrb.mxu3 %v915_v24 }
  0x38   :  { %389 = vmatpush.bf16.msrb.mxu0 %v686_v56 }
  0x39   :  { %402 = vmatpush.bf16.msrb.mxu1 %v750_v57  ;;  %550 = vmatpush.bf16.msrb.mxu2 %v906_v41 }
  0x3b   :  { %563 = vmatpush.bf16.msrb.mxu3 %v914_v26 }
  0x3c   :  { %390 = vmatpush.bf16.msrb.mxu0 %v678_v2 }
  0x3d   :  { %403 = vmatpush.bf16.msrb.mxu1 %v742_v5  ;;  %551 = vmatpush.bf16.msrb.mxu2 %v905_v43 }
  0x3f   :  { %564 = vmatpush.bf16.msrb.mxu3 %v913_v28 }
  0x40   :  { %391 = vmatpush.bf16.msrb.mxu0 %v670_v14 }
  0x41   :  { %404 = vmatpush.bf16.msrb.mxu1 %v734_v17  ;;  %552 = vmatpush.bf16.msrb.mxu2 %v904_v45 }
  0x43   :  { %565 = vmatpush.bf16.msrb.mxu3 %v912_v42 }
  0x45   :  { %553 = vmatpush.bf16.msrb.mxu2 %v903_v46 }
  0x47   :  { %566 = vmatpush.bf16.msrb.mxu3 %v911_v44 }
  0xa0   :  { %v139_v31 = vpop.f32.mrf.mxu0 }
  0xa1   :  { %v140_v32 = vadd.f32 %v139_v31, %v46_v29  ;;  %v152_v33 = vpop.f32.mrf.mxu1 }
  0xa2   :  { %v153_v34 = vadd.f32 %v152_v33, %v47_v30 }
  0xa3   :  { %v156_v35 = vmax.f32 %v140_v32, 0.0 }
  0xa4   :  { %v157_v36 = vmax.f32 %v153_v34, 0.0 }
  0xa5   :  { %v158_v37 = vpack.c.bf16 %v156_v35, %v156_v35 }
  0xa6   :  { %v159_v38 = vpack.c.bf16 %v157_v36, %v157_v36 }
  0xa7   :  { %366 = vmatmul.bf16.vlgmr.msra.gmra.mxu2 %v158_v37  ;;  %392 = vmatmul.bf16.vlgmr.msrb.gmra.mxu0 %v158_v37 }
  0xa8   :  { %379 = vmatmul.bf16.vlgmr.msra.gmra.mxu3 %v159_v38  ;;  %405 = vmatmul.bf16.vlgmr.msrb.gmra.mxu1 %v159_v38  ;;  %v141_v39 = vpop.f32.mrf.mxu0 }
  0xa9   :  { %v154_v40 = vpop.f32.mrf.mxu1 }
 0x124   :  { %v393_v49 = vpop.f32.mrf.mxu0 }
 0x125   :  { %v394_v50 = vadd.f32 %v393_v49, %v195_v48  ;;  %v406_v51 = vpop.f32.mrf.mxu1 }
 0x127   :  { %v407_v52 = vadd.f32 %v406_v51, %v394_v50 }
 0x129   :  { %v411_v54 = vmax.f32 %v407_v52, 0.0 }
 0x12a   :  { %v367_v55 = vpop.f32.mrf.mxu2 }
 0x12b   :  { %v413_v56 = vpack.c.bf16 %v411_v54, %v411_v54  ;;  %v368_v57 = vadd.f32 %v367_v55, %v194_v53  ;;  %v380_v58 = vpop.f32.mrf.mxu3 }
 0x12c   :  { %v395_v59 = vpop.f32.mrf.mxu0 }
 0x12d   :  { %v381_v60 = vadd.f32 %v380_v58, %v368_v57  ;;  %v408_v61 = vpop.f32.mrf.mxu1  ;;  %567 = vmatmul.bf16.vlgmr.msrb.gmra.mxu3 %v413_v56 }
 0x12f   :  { %v410_v62 = vmax.f32 %v381_v60, 0.0 }
 0x131   :  { %v412_v63 = vpack.c.bf16 %v410_v62, %v410_v62 }
 0x132   :  { %v369_v0 = vpop.f32.mrf.mxu2 }
 0x133   :  { %v382_v1 = vpop.f32.mrf.mxu3  ;;  %554 = vmatmul.bf16.vlgmr.msrb.gmra.mxu2 %v412_v63 }
 0x1b0   :  { %v568_v2 = vpop.f32.mrf.mxu3 }
 0x1b6   :  { %v555_v4 = vpop.f32.mrf.mxu2 }
 0x1b7   :  { %v556_v5 = vadd.f32 %v919_v3, %v555_v4 }
 0x1b8   :  { %v570_v6 = vpop.f32.mrf.mxu3 }
 0x1b9   :  { %v569_v7 = vadd.f32 %v568_v2, %v556_v5 }
 0x1bb   :  { %572 = vmax.xlane.f32.xlu0 %v569_v7 }
 0x1be   :  { %v557_v8 = vpop.f32.mrf.mxu2 }
 0x22e   :  { %v573_v9 = vpop.xlane.xlu0 %572 }
 0x22f   :  { %v574_v10 = vsub.f32 %v569_v7, %v573_v9 }
 0x231   :  { %v575_v11 = vmul.f32 1.442695, %v574_v10 }
 0x233   :  { %920 = vpow2.f32 %v575_v11 }
 0x239   :  { %v921_v12 = vpop.eup %920 }
 0x23a   :  { %577 = vadd.xlane.f32.xlu0 %v921_v12 }
 0x2ad   :  { %v578_v13 = vpop.xlane.xlu0 %577 }
 0x2ae   :  { %922 = vrcp.f32 %v578_v13  ;;  %v590_v17 = vand.u32 2147483648, %v578_v13  ;;  %v588_v19 = vand.u32 2147483647, %v578_v13  ;;  %vm584_vm1 = vweird.f32 %v578_v13 }
 0x2b0   :  { %v591_v21 = vor.u32 1.1754944e-38, %v590_v17  ;;  %vm589_vm3 = vcmp.eq.f32.partialorder %v588_v19, 8.507059e+37 }
 0x2b4   :  { %v923_v14 = vpop.eup %922 }
 0x2b5   :  { %v580_v15 = vmul.f32 %v923_v14, %v578_v13  ;;  %vm585_vm0 = vweird.f32 %v923_v14 }
 0x2b6   :  { %vm586_vm2 = vmor %vm584_vm1, %vm585_vm0 }
 0x2b7   :  { %v581_v16 = vsub.f32 1.0, %v580_v15 }
 0x2b9   :  { %v582_v18 = vmul.f32 %v923_v14, %v581_v16 }
 0x2bb   :  { %v583_v20 = vadd.f32 %v923_v14, %v582_v18 }
 0x2bd   :  { %v587_v22 = vsel %vm586_vm2, %v923_v14, %v583_v20 }
 0x2be   :  { %v592_v23 = vsel %vm589_vm3, %v591_v21, %v587_v22 }
 0x2bf   :  { %v593_v24 = vmul.f32 %v921_v12, %v592_v23 }
 0x2c1   :  { %594 = vst [vmem:[%s1322_s7] sm:$0xff] %v593_v24 }

</bundles_post_ra>
